<compile_context>
chip_gen: v7x
topology: tpu7x:2x2x1
jax: 0.10.0
libtpu: 0.0.40
codegen_flags: <defaults>
</compile_context>

<pallas_src>
import jax
import jax.numpy as jnp
from jax.experimental import pallas as pl
from jax.experimental.pallas import tpu as pltpu


def _scale_kernel(scale_ref, x_ref, o_ref):
    # scale_ref: (1, 1) f32 scalar in SMEM; x_ref / o_ref: VMEM tiles in x.dtype.
    s = scale_ref[0, 0].astype(x_ref.dtype)  # native-dtype multiply (bf16 stays bf16)
    o_ref[...] = x_ref[...] * s


def _round_up(a, m):
    return -(-a // m) * m


def _tensorcores_per_chip():
    # Only v7x has 2 TensorCores per chip; on v5e/v6e the grid is a serial loop.
    try:
        kind = jax.devices()[0].device_kind.lower()
    except Exception:
        return 1
    return 2 if "v7" in kind else 1


def scale_forward(x, scale):
    """x: arbitrary-shaped array (NCHW here); scale: scalar parameter (shape (1,))."""
    orig_shape = x.shape
    dtype = x.dtype
    total = x.size
    itemsize = jnp.dtype(dtype).itemsize
    s_f32 = jnp.asarray(scale, jnp.float32).reshape(-1)[0]

    if total == 0:
        return x

    # Widest lane-dense last dim that exactly divides the flat length.
    lanes = 128
    for cand in (1024, 512, 256, 128):
        if total % cand == 0:
            lanes = cand
            break

    x_flat = jnp.ravel(x)
    bulk = (total // lanes) * lanes
    tail = total - bulk

    if bulk == 0:
        # Fewer than 128 elements: a dedicated kernel pass is pure overhead.
        return (x_flat * s_f32.astype(dtype)).reshape(orig_shape)

    rows = bulk // lanes

    # Dtype-aware sublane packing: 8 rows for 4-byte, 16 for 2-byte, 32 for 1-byte dtypes.
    sublane = max(8, 32 // itemsize)

    # ~4 MiB blocks: 2 streams x 2 buffers x 4 MiB = 16 MiB VMEM (safe everywhere with
    # vmem_limit_bytes = 32 MiB; v7x physical VMEM is 64 MiB, v5e/v6e 128 MiB).
    target_block_bytes = 4 << 20
    tile_cap = max(
        sublane,
        _round_up(max(1, target_block_bytes // (lanes * itemsize)), sublane),
    )

    cores = _tensorcores_per_chip()
    if cores >= 2 and rows > sublane:
        # Megacore (v7x): even number of grid steps so both TCs get balanced shards.
        steps = max(2, pl.cdiv(rows, tile_cap))
        if steps % 2:
            steps += 1
        tile_rows = min(_round_up(pl.cdiv(rows, steps), sublane), rows)
    else:
        # Single TC: biggest legal tile; full extent if it fits one block.
        tile_rows = rows if rows <= tile_cap else tile_cap

    grid = (pl.cdiv(rows, tile_rows),)

    scale_smem = s_f32.reshape(1, 1)

    out2d = pl.pallas_call(
        _scale_kernel,
        out_shape=jax.ShapeDtypeStruct((rows, lanes), dtype),
        grid_spec=pltpu.PrefetchScalarGridSpec(
            num_scalar_prefetch=0,
            grid=grid,
            in_specs=[
                pl.BlockSpec(memory_space=pltpu.MemorySpace.SMEM),   # scale scalar
                pl.BlockSpec((tile_rows, lanes), lambda i: (i, 0)),  # x tile
            ],
            out_specs=pl.BlockSpec((tile_rows, lanes), lambda i: (i, 0)),
        ),
        compiler_params=pltpu.CompilerParams(
            dimension_semantics=("parallel",),
            vmem_limit_bytes=32 << 20,
        ),
        cost_estimate=pl.CostEstimate(
            flops=total,
            transcendentals=0,
            bytes_accessed=2 * total * itemsize,
        ),
    )(scale_smem, x_flat[:bulk].reshape(rows, lanes))

    out_flat = out2d.reshape(-1)
    if tail:
        # Sub-128-element tail handled by XLA: avoids full pad + slice HBM passes.
        out_flat = jnp.concatenate([out_flat, x_flat[bulk:] * s_f32.astype(dtype)])
    return out_flat.reshape(orig_shape)


if __name__ == "__main__":
    key = jax.random.PRNGKey(0)

    # Parameter init: Scale(init_value=1.0) -> torch.FloatTensor([1.0]); use a
    # non-trivial deterministic value so the multiply is actually exercised.
    scale_param = jnp.array([0.75], dtype=jnp.float32)

    # NCHW activation like the conv head output feeding Scale in SiamTITP.
    x = jax.random.normal(key, (2, 4, 16, 16), dtype=jnp.float32)
    out = jax.block_until_ready(scale_forward(x, scale_param))
    assert out.shape == x.shape and out.dtype == x.dtype
    assert jnp.allclose(out, x * scale_param[0], atol=1e-6, rtol=1e-6)

    # Ragged size: exercises the bulk-kernel + XLA-tail path (no pad/slice copies).
    x2 = jax.random.normal(jax.random.PRNGKey(1), (3, 5, 7, 11), dtype=jnp.float32)
    out2 = jax.block_until_ready(scale_forward(x2, scale_param))
    assert out2.shape == x2.shape and out2.dtype == x2.dtype
    assert jnp.allclose(out2, x2 * scale_param[0], atol=1e-6, rtol=1e-6)

    # bf16: exercises native-dtype multiply + 16-row sublane alignment.
    x3 = jax.random.normal(jax.random.PRNGKey(2), (2, 4, 16, 16), dtype=jnp.bfloat16)
    out3 = jax.block_until_ready(scale_forward(x3, scale_param))
    ref3 = x3 * jnp.bfloat16(0.75)
    assert out3.shape == x3.shape and out3.dtype == x3.dtype
    assert jnp.allclose(out3.astype(jnp.float32), ref3.astype(jnp.float32),
                        atol=1e-2, rtol=1e-2)

    print("KERNEL_OK")
</pallas_src>

<mosaic_0001>
module attributes {stable_mosaic.version = 11 : i64} {
  func.func @_scale_kernel(%arg0: i32, %arg1: memref<1x1xf32, #tpu.memory_space<smem>>, %arg2: memref<2x1024xf32, #tpu.memory_space<vmem>>, %arg3: memref<2x1024xf32, #tpu.memory_space<vmem>>) attributes {dimension_semantics = [#tpu.dimension_semantics<parallel>], iteration_bounds = array<i64: 1>, scalar_prefetch = 0 : i64, scratch_operands = 0 : i64, tpu.core_type = #tpu.core_type<tc>, window_params = [{transform_indices = @transform_0, window_bounds = array<i64: 1, 1>}, {transform_indices = @transform_1, window_bounds = array<i64: 2, 1024>}, {transform_indices = @transform_2, window_bounds = array<i64: 2, 1024>}]} {
    %c0 = arith.constant 0 : index
    %c0_0 = arith.constant 0 : index
    %0 = memref.load %arg1[%c0, %c0_0] : memref<1x1xf32, #tpu.memory_space<smem>>
    %c0_1 = arith.constant 0 : index
    %c0_2 = arith.constant 0 : index
    %1 = vector.load %arg2[%c0_1, %c0_2] : memref<2x1024xf32, #tpu.memory_space<vmem>>, vector<2x1024xf32>
    %2 = vector.broadcast %0 : f32 to vector<2x1024xf32>
    %3 = arith.mulf %1, %2 : vector<2x1024xf32>
    %c0_3 = arith.constant 0 : index
    %c0_4 = arith.constant 0 : index
    %4 = vector.load %arg3[%c0_3, %c0_4] : memref<2x1024xf32, #tpu.memory_space<vmem>>, vector<2x1024xf32>
    tpu.vector_store %arg3[%c0_3, %c0_4], %3 {strides = array<i32>} : memref<2x1024xf32, #tpu.memory_space<vmem>>, vector<2x1024xf32>,
    return
  }
  func.func @transform_0(%arg0: i32) -> (i32, i32) {
    %c0_i32 = arith.constant 0 : i32
    %c0_i32_0 = arith.constant 0 : i32
    %c0_i32_1 = arith.constant 0 : i32
    return %c0_i32, %c0_i32_0 : i32, i32
  }
  func.func @transform_1(%arg0: i32) -> (i32, i32) {
    %c0_i32 = arith.constant 0 : i32
    %c0_i32_0 = arith.constant 0 : i32
    return %arg0, %c0_i32 : i32, i32
  }
  func.func @transform_2(%arg0: i32) -> (i32, i32) {
    %c0_i32 = arith.constant 0 : i32
    %c0_i32_0 = arith.constant 0 : i32
    return %arg0, %c0_i32 : i32, i32
  }
}

</mosaic_0001>

<bundles_post_ra>
// kernel: tpu_custom_call.1
= control target key start
LH: loop header
LB: loop body
LE: loop exit
PB: predicated region body
PF: predicated region fallthrough
CT: control target
= control target key end

     0   :  { %8 = vsyncpa [#allocation4], 0  ;;  %s142_s0 = inlined_call_operand.<no memory space> [shape: f32[1,1], index: 0, kind: input, shape index: {}]   ;;  %s143_s1 = inlined_call_operand.hbm [shape: f32[2,1024], index: 1, kind: input, shape index: {}]   ;;  %s144_s2 = inlined_call_operand.hbm [shape: f32[2,1024], index: 2, kind: output, shape index: {}]  }
   0x1   :  { %9 = vsyncpa [#allocation5], 0  ;;  %s98_s9 = smov [#allocation3]   ;;  %s50_s13 = scalar_lea.hbm %s143_s1, 256 }
   0x2   :  { %s18_s10 = sshll.u32 %s98_s9, 4  ;;  %p51_p0 = scmp.ne.s32.totalorder %s143_s1, %s50_s13  ;;  %s19_s10 = int_to_ptr.vmem [resolvable:$true] %s18_s10 }
   0x3   :  { %p54_p1 = scmp.lt.u32.totalorder %s50_s13, %s143_s1 }
   0x5   :  { %p56_p2 = pnand %p54_p1, %p51_p0 }
   0x7   :  { %59 = shalt.err (!%p56_p2)
}
   0x8   :  { %s60_s18 = scalar_lea.vmem %s19_s10, 256  ;;  %p65_p4 = scmp.lt.s32.totalorder %s19_s10, %s19_s10 }
   0x9   :  { %p61_p3 = scmp.ne.s32.totalorder %s19_s10, %s60_s18  ;;  %p66_p5 = scmp.lt.s32.totalorder %s60_s18, %s60_s18 }
   0xb   :  { %p67_p6 = por %p66_p5, %p65_p4 }
   0xd   :  { %p68_p7 = pnand %p67_p6, %p61_p3 }
   0xf   :  { %71 = shalt.err (!%p68_p7)
}
  0x10   :  { %21 = dma.hbm_to_vmem [thread:$0]  %s143_s1, 256, %s19_s10, [#allocation4]  }
  0x11   :  { %94 = dma.done.wait [#allocation4], 256  }
  0x12   :  { %95 = vsyncadd [#allocation4], 4294967040  ;;  %v28_v0 = vstv %s142_s0  ;;  %s99_s23 = smov [#allocation6]   ;;  %v26_v1 = vld [vmem:[#allocation3] sm:$0xff]  ;;  %v27_v2 = vld [vmem:[#allocation3 + $0x8] sm:$0xff] }
  0x13   :  { %s39_s24 = sshll.u32 %s99_s23, 4  ;;  %v29_v3 = vmul.f32 %v28_v0, %v26_v1  ;;  %v30_v4 = vmul.f32 %v28_v0, %v27_v2  ;;  %s40_s24 = int_to_ptr.vmem [resolvable:$true] %s39_s24 }
  0x14   :  { %s72_s25 = scalar_lea.vmem %s40_s24, 256  ;;  %p77_p9 = scmp.lt.s32.totalorder %s40_s24, %s40_s24 }
  0x15   :  { %31 = vst [vmem:[#allocation6] sm:$0xff] %v29_v3  ;;  %32 = vst [vmem:[#allocation6 + $0x8] sm:$0xff] %v30_v4  ;;  %p73_p8 = scmp.ne.s32.totalorder %s40_s24, %s72_s25  ;;  %p78_p10 = scmp.lt.s32.totalorder %s72_s25, %s72_s25 }
  0x17   :  { %p79_p11 = por %p78_p10, %p77_p9 }
  0x19   :  { %p80_p12 = pnand %p79_p11, %p73_p8 }
  0x1b   :  { %83 = shalt.err (!%p80_p12)
}
  0x1c   :  { %s84_s0 = scalar_lea.hbm %s144_s2, 256 }
  0x1d   :  { %p85_p13 = scmp.ne.s32.totalorder %s144_s2, %s84_s0  ;;  %p88_p0 = scmp.lt.u32.totalorder %s84_s0, %s144_s2 }
  0x1f   :  { %p90_p1 = pnand %p88_p0, %p85_p13 }
  0x21   :  { %93 = shalt.err (!%p90_p1)
}
  0x22   :  { %42 = dma.vmem_to_hbm [thread:$0]  %s40_s24, 256, %s144_s2, [#allocation5]  }
  0x23   :  { %96 = dma.done.wait [#allocation5], 256  }
  0x24   :  { %97 = vsyncadd [#allocation5], 4294967040 }
  0x25   :  { %46 = vsyncpa [#allocation4], 1 }
  0x26   :  { %47 = vsyncpa [#allocation5], 1 }

</bundles_post_ra>
